<compile_context>
chip_gen: v7x
topology: tpu7x:2x2x1
jax: 0.10.0
libtpu: 0.0.40
codegen_flags: <defaults>
</compile_context>

<pallas_src>
import jax
import jax.numpy as jnp
from jax import lax
from jax.experimental import pallas as pl
from jax.experimental.pallas import tpu as pltpu


def _sam_kernel(gamma_ref, xd_ref, x_ref, out_ref):
    # gamma_ref: SMEM (1,) f32  (scalar prefetch)
    # xd_ref:    VMEM (1, C, Nd) — downsampled features, spatially flattened
    # x_ref:     VMEM (1, C, TN) — one spatial tile of the full-res features
    # out_ref:   VMEM (1, C, TN)
    q = xd_ref[0]                                                    # (C, Nd), native dtype
    # Channel Gram matrix Q @ Q^T on the MXU, contracting the last dim of both
    # operands directly (avoids materializing a transpose).
    s = lax.dot_general(
        q, q, dimension_numbers=(((1,), (1,)), ((), ())),
        preferred_element_type=jnp.float32)                          # (C, C) f32
    # Row-wise stable softmax == torch.softmax(dim=-1).
    s_max = jnp.max(s, axis=-1, keepdims=True)
    e = jnp.exp(s - s_max)
    a = e * pl.reciprocal(jnp.sum(e, axis=-1, keepdims=True), approx=True)
    # Fold gamma into the small (C, C) matrix instead of scaling the (C, TN) result.
    a = (gamma_ref[0] * a).astype(x_ref.dtype)
    v = x_ref[0]                                                     # (C, TN), native dtype
    o = jnp.dot(a, v, preferred_element_type=jnp.float32)            # (C, TN) f32
    out_ref[0] = (o + v.astype(jnp.float32)).astype(out_ref.dtype)


def _choose_tile_n(N, C, itemsize, budget_bytes=16 << 20):
    """Largest spatial tile TN (multiple of 128, dividing N) keeping the
    double-buffered (C, TN) input + output slabs under `budget_bytes`."""
    if N % 128 != 0:
        # Full-dim block is always legal; only expected for toy shapes.
        return N
    max_tn = max(128, ((budget_bytes // (4 * C * itemsize)) // 128) * 128)
    tn = min(N, max_tn)
    while N % tn != 0:
        tn -= 128
    return tn


def sam_forward(gamma, x_down, x):
    """gamma: (1,) f32; x_down: (B,C,sH,sW); x: (B,C,H,W) -> (B,C,H,W)."""
    B, C, H, W = x.shape
    Bd, Cd, Hd, Wd = x_down.shape
    assert B == Bd and C == Cd
    N = H * W
    Nd = Hd * Wd

    xd_flat = x_down.reshape(B, C, Nd)
    x_flat = x.reshape(B, C, N)

    itemsize = jnp.dtype(x.dtype).itemsize
    tn = _choose_tile_n(N, C, itemsize)
    n_tiles = N // tn

    gamma = jnp.asarray(gamma, dtype=jnp.float32).reshape((1,))

    cost = pl.CostEstimate(
        flops=2 * B * n_tiles * C * C * Nd + 2 * B * C * C * N,
        transcendentals=B * n_tiles * C * C,
        bytes_accessed=B * (n_tiles * C * Nd + 2 * C * N) * itemsize,
    )

    out_flat = pl.pallas_call(
        _sam_kernel,
        out_shape=jax.ShapeDtypeStruct((B, C, N), x.dtype),
        grid_spec=pltpu.PrefetchScalarGridSpec(
            num_scalar_prefetch=1,          # gamma -> SMEM
            grid=(B, n_tiles),
            in_specs=[
                pl.BlockSpec((1, C, Nd), lambda b, n, g: (b, 0, 0)),
                pl.BlockSpec((1, C, tn), lambda b, n, g: (b, 0, n)),
            ],
            out_specs=pl.BlockSpec((1, C, tn), lambda b, n, g: (b, 0, n)),
        ),
        compiler_params=pltpu.CompilerParams(
            dimension_semantics=("parallel", "parallel"),
            vmem_limit_bytes=48 * 1024 * 1024,
        ),
        cost_estimate=cost,
    )(gamma, xd_flat, x_flat)

    return out_flat.reshape(B, C, H, W)


def sam_reference(gamma, x_down, x):
    """Pure-JAX reference mirroring the PyTorch forward."""
    B, C, H, W = x.shape
    Q = x_down.reshape(B, C, -1)
    K = jnp.transpose(Q, (0, 2, 1))
    A = jax.nn.softmax(jnp.einsum("bcn,bnk->bck", Q, K), axis=-1)
    V = x.reshape(B, C, -1)
    out = jnp.einsum("bck,bkn->bcn", A, V).reshape(B, C, H, W)
    return gamma[0] * out + x


if __name__ == "__main__":
    key = jax.random.PRNGKey(0)
    k1, k2 = jax.random.split(key)

    B, C, H, W = 2, 4, 16, 16
    Hd, Wd = 8, 8  # downsampled spatial dims (s*H, s*W with s=1/2)

    x = jax.random.normal(k1, (B, C, H, W), dtype=jnp.float32)
    x_down = jax.random.normal(k2, (B, C, Hd, Wd), dtype=jnp.float32)

    # Parameter per __init__: gamma = nn.Parameter(torch.zeros(1))
    gamma = jnp.zeros((1,), dtype=jnp.float32)

    out = sam_forward(gamma, x_down, x)
    jax.block_until_ready(out)
    ref = sam_reference(gamma, x_down, x)
    assert jnp.allclose(out, ref, atol=1e-5, rtol=1e-5)

    # Exercise the attention path with a non-trivial gamma (zero-init gamma makes
    # out == x, which would hide matmul/softmax bugs). Tolerance accounts for the
    # EUP approx reciprocal in the softmax denominator.
    gamma_nz = jnp.array([0.5], dtype=jnp.float32)
    out_nz = sam_forward(gamma_nz, x_down, x)
    jax.block_until_ready(out_nz)
    ref_nz = sam_reference(gamma_nz, x_down, x)
    assert jnp.allclose(out_nz, ref_nz, atol=2e-3, rtol=2e-3)

    print("KERNEL_OK")
</pallas_src>

<mosaic_0001>
module attributes {stable_mosaic.version = 11 : i64} {
  func.func @_sam_kernel(%arg0: i32, %arg1: i32, %arg2: memref<1xf32, #tpu.memory_space<smem>>, %arg3: memref<1x4x64xf32, #tpu.memory_space<vmem>>, %arg4: memref<1x4x256xf32, #tpu.memory_space<vmem>>, %arg5: memref<1x4x256xf32, #tpu.memory_space<vmem>>) attributes {dimension_semantics = [#tpu.dimension_semantics<parallel>, #tpu.dimension_semantics<parallel>], iteration_bounds = array<i64: 2, 1>, scalar_prefetch = 1 : i64, scratch_operands = 0 : i64, tpu.core_type = #tpu.core_type<tc>, window_params = [{transform_indices = @transform_0, window_bounds = array<i64: 1, 4, 64>}, {transform_indices = @transform_1, window_bounds = array<i64: 1, 4, 256>}, {transform_indices = @transform_2, window_bounds = array<i64: 1, 4, 256>}]} {
    %c0 = arith.constant 0 : index
    %c0_0 = arith.constant 0 : index
    %c0_1 = arith.constant 0 : index
    %0 = vector.load %arg3[%c0, %c0_0, %c0_1] : memref<1x4x64xf32, #tpu.memory_space<vmem>>, vector<1x4x64xf32>
    %1 = vector.shape_cast %0 : vector<1x4x64xf32> to vector<4x64xf32>
    %cst = arith.constant dense<0.000000e+00> : vector<4x4xf32>
    %2 = tpu.matmul %1, %1, %cst {dimension_numbers = #tpu.dot_dimension_numbers<[1], [1], [0], [0], [0, 0, 1, 0], [], []>} : vector<4x64xf32>, vector<4x64xf32>, vector<4x4xf32> -> vector<4x4xf32>
    %cst_2 = arith.constant dense<0xFF800000> : vector<4xf32>
    %3 = vector.multi_reduction <maximumf>, %2, %cst_2 [1] : vector<4x4xf32> to vector<4xf32>
    %4 = vector.shape_cast %3 : vector<4xf32> to vector<4x1xf32>
    %5 = vector.broadcast %4 : vector<4x1xf32> to vector<4x4xf32>
    %6 = arith.subf %2, %5 : vector<4x4xf32>
    %7 = math.exp %6 : vector<4x4xf32>
    %cst_3 = arith.constant dense<0.000000e+00> : vector<4xf32>
    %8 = vector.multi_reduction <add>, %7, %cst_3 [1] : vector<4x4xf32> to vector<4xf32>
    %9 = vector.shape_cast %8 : vector<4xf32> to vector<4x1xf32>
    %10 = tpu.reciprocal %9 {approx = true} : vector<4x1xf32> -> vector<4x1xf32>
    %11 = vector.broadcast %10 : vector<4x1xf32> to vector<4x4xf32>
    %12 = arith.mulf %7, %11 : vector<4x4xf32>
    %c0_4 = arith.constant 0 : index
    %13 = memref.load %arg2[%c0_4] : memref<1xf32, #tpu.memory_space<smem>>
    %14 = vector.broadcast %13 : f32 to vector<4x4xf32>
    %15 = arith.mulf %14, %12 : vector<4x4xf32>
    %c0_5 = arith.constant 0 : index
    %c0_6 = arith.constant 0 : index
    %c0_7 = arith.constant 0 : index
    %16 = vector.load %arg4[%c0_5, %c0_6, %c0_7] : memref<1x4x256xf32, #tpu.memory_space<vmem>>, vector<1x4x256xf32>
    %17 = vector.shape_cast %16 : vector<1x4x256xf32> to vector<4x256xf32>
    %cst_8 = arith.constant dense<0.000000e+00> : vector<4x256xf32>
    %18 = tpu.matmul %15, %17, %cst_8 {dimension_numbers = #tpu.dot_dimension_numbers<[1], [0], [0], [1], [0, 0, 1, 1], [], []>} : vector<4x4xf32>, vector<4x256xf32>, vector<4x256xf32> -> vector<4x256xf32>
    %19 = arith.addf %18, %17 : vector<4x256xf32>
    %c0_9 = arith.constant 0 : index
    %c0_10 = arith.constant 0 : index
    %c0_11 = arith.constant 0 : index
    %20 = vector.load %arg5[%c0_9, %c0_10, %c0_11] : memref<1x4x256xf32, #tpu.memory_space<vmem>>, vector<1x4x256xf32>
    %21 = vector.shape_cast %20 : vector<1x4x256xf32> to vector<4x256xf32>
    %22 = vector.shape_cast %19 : vector<4x256xf32> to vector<1x4x256xf32>
    tpu.vector_store %arg5[%c0_9, %c0_10, %c0_11], %22 {strides = array<i32>} : memref<1x4x256xf32, #tpu.memory_space<vmem>>, vector<1x4x256xf32>,
    return
  }
  func.func @transform_0(%arg0: i32, %arg1: i32, %arg2: memref<1xf32, #tpu.memory_space<smem>>) -> (i32, i32, i32) {
    %c0_i32 = arith.constant 0 : i32
    %c0_i32_0 = arith.constant 0 : i32
    %c0_i32_1 = arith.constant 0 : i32
    return %arg0, %c0_i32, %c0_i32_0 : i32, i32, i32
  }
  func.func @transform_1(%arg0: i32, %arg1: i32, %arg2: memref<1xf32, #tpu.memory_space<smem>>) -> (i32, i32, i32) {
    %c0_i32 = arith.constant 0 : i32
    %c0_i32_0 = arith.constant 0 : i32
    return %arg0, %c0_i32, %arg1 : i32, i32, i32
  }
  func.func @transform_2(%arg0: i32, %arg1: i32, %arg2: memref<1xf32, #tpu.memory_space<smem>>) -> (i32, i32, i32) {
    %c0_i32 = arith.constant 0 : i32
    %c0_i32_0 = arith.constant 0 : i32
    return %arg0, %c0_i32, %arg1 : i32, i32, i32
  }
}

</mosaic_0001>

<bundles_post_ra>
// kernel: tpu_custom_call.1
= control target key start
LH: loop header
LB: loop body
LE: loop exit
PB: predicated region body
PF: predicated region fallthrough
CT: control target
= control target key end

     0   :  { %s1023_s0 = inlined_call_operand.<no memory space> [shape: f32[1], index: 0, kind: input, shape index: {}]   ;;  %s1024_s1 = inlined_call_operand.hbm [shape: f32[2,4,64], index: 1, kind: input, shape index: {}]   ;;  %s1025_s2 = inlined_call_operand.hbm [shape: f32[2,4,256], index: 2, kind: input, shape index: {}]   ;;  %s1026_s3 = inlined_call_operand.hbm [shape: f32[2,4,256], index: 3, kind: output, shape index: {}]  }
   0x1   :  { %8 = sst [smem:[#allocation3]] %s1023_s0 }
   0x2   :  { %9 = vsyncpa [#allocation5], 0 }
   0x3   :  { %11 = vsyncpa [#allocation5 + $0x1], 0 }
   0x4   :  { %12 = vsyncpa [#allocation8], 0 }
   0x5   :  { %14 = vsyncpa [#allocation8 + $0x1], 0 }
   0x6   :  { %15 = vsyncpa [#allocation6], 0 }
   0x7   :  { %17 = vsyncpa [#allocation6 + $0x1], 0  ;;  %s804_s14 = smov 0   ;;  %s806_s15 = smov 0  }
   0x8   :  { %s808_s16 = smov 0   ;;  %s810_s17 = smov 0  }
   0x9   :  { %s812_s18 = smov 0   ;;  %s814_s19 = smov 0  }
   0xa LB: > { %s522_s0 = sadd.s32 4294967295, %s774_s19   ;;  %s523_s20 = sadd.s32 4294967294, %s774_s19   ;;  %s774_s19 = sphi %s814_s19, %s23_s19   ;;  %s770_s18 = sphi %s812_s18, %s1046_s18   ;;  %s766_s17 = sphi %s810_s17, %s1045_s17   ;;  %s762_s16 = sphi %s808_s16, %s1044_s16   ;;  %s758_s15 = sphi %s806_s15, %s1043_s15   ;;  %s754_s14 = sphi %s804_s14, %s1042_s14  }
   0xb   : > { %s35_s21 = sadd.s32 1, %s770_s18  ;;  %s42_s22 = sadd.s32 1, %s762_s16 }
   0xc   : > { %p37_p0 = scmp.ge.s32.totalorder %s35_s21, 2  ;;  %p49_p1 = scmp.ne.s32.totalorder %s762_s16, %s758_s15 }
   0xd   : > { %p50_p2 = scmp.eq.s32.totalorder %s774_s19, 0  ;;  %p55_p3 = scmp.ne.s32.totalorder %s758_s15, %s754_s14 }
   0xe   : > { %s1048_s21 = smov (%p37_p0, %s35_s21), 0  ;;  %p56_p5 = scmp.eq.s32.totalorder %s522_s0, 0 }
   0xf   : > { %p845_p4 = por %p50_p2, %p49_p1  ;;  %s39_s24 = ssub.s32 %s770_s18, %s1048_s21 }
  0x10   : > { %p109_p6 = scmp.eq.s32.totalorder %s522_s0, 1  ;;  %p40_p7 = scmp.eq.s32.totalorder %s39_s24, 0 }
  0x11   : > { %p851_p8 = por %p56_p5, %p55_p3  ;;  %p115_p10 = scmp.eq.s32.totalorder %s523_s20, 1 }
  0x12   : > { %p855_p9 = por %p109_p6, %p49_p1  ;;  %p571_p13 = scmp.lt.s32.totalorder %s774_s19, 2 }
  0x13   : > { %s1030_s25 = scalar_select %p851_p8, 1, 0 }
  0x14   : > { %s1031_s26 = scalar_select %p855_p9, 1, 0 }
  0x15   : > { %s860_s27 = scalar_select %p40_p7, %s762_s16, %s42_s22  }
  0x16   : > { %p862_p11 = por %p115_p10, %p55_p3  ;;  %s869_s29 = sand.u32 1, %s762_s16  }
  0x17   : > { %s526_s30 = sshll.u32 %s869_s29, 2  ;;  %s527_s4 = sshll.u32 %s770_s18, 6 }
  0x18   : > { %s1032_s28 = scalar_select %p862_p11, 1, 0 }
  0x19   : > { %s876_s7 = scalar_lea.hbm %s1024_s1, %s527_s4  ;;  %s139_s8 = scalar_lea.vmem [#allocation4], %s526_s30 }
  0x1a   : > { %s146_s9 = sshll.u32 %s139_s8, 4  ;;  %p882_p0 = pnand %p571_p13, %p845_p4  ;;  %s878_s9 = int_to_ptr.vmem [resolvable:$true] %s146_s9 }
  0x1b   : > { %s136_s11 = scalar_lea.sflag [#allocation5], %s869_s29  ;;  %s628_s12 = scalar_lea.hbm %s876_s7, 64 }
  0x1c   : > { %p629_p3 = scmp.ne.s32.totalorder %s876_s7, %s628_s12  ;;  %p630_p5 = pneg %p882_p0 }
  0x1d   : > { %s633_s20 = scalar_lea.hbm %s1024_s1, 128  ;;  %p634_p4 = scmp.lt.u32.totalorder %s876_s7, %s1024_s1 }
  0x1e   : > { %p631_p6 = pnand %p630_p5, %p629_p3  ;;  %p635_p10 = scmp.lt.u32.totalorder %s633_s20, %s628_s12 }
  0x1f   : > { %p637_p12 = scmp.lt.u32.totalorder %s628_s12, %s876_s7 }
  0x20   : > { %p632_p7 = pneg %p631_p6  ;;  %p636_p13 = por %p635_p10, %p634_p4 }
  0x22   : > { %p638_p1 = por %p637_p12, %p636_p13 }
  0x24   : > { %p639_p2 = pnand %p638_p1, %p632_p7 }
  0x26   : > { %642 = shalt.err (!%p639_p2)
}
  0x27   : > { %s643_s24 = scalar_lea.vmem %s878_s9, 64  ;;  %s776_s30 = smov [#allocation4]  }
  0x28   : > { %p644_p3 = scmp.ne.s32.totalorder %s878_s9, %s643_s24  ;;  %s648_s4 = sshll.u32 %s776_s30, 4  ;;  %s649_s4 = int_to_ptr.vmem [resolvable:$false] %s648_s4 }
  0x29   : > { %s650_s5 = scalar_lea.vmem %s649_s4, 128  ;;  %p651_p9 = scmp.lt.s32.totalorder %s878_s9, %s649_s4 }
  0x2a   : > { %p646_p6 = pnand %p644_p3, %p630_p5  ;;  %p652_p4 = scmp.lt.s32.totalorder %s650_s5, %s643_s24 }
  0x2c   : > { %p647_p11 = pneg %p646_p6  ;;  %p653_p10 = por %p652_p4, %p651_p9 }
  0x2e   : > { %p654_p12 = pnand %p653_p10, %p647_p11 }
  0x30   : > { %657 = shalt.err (!%p654_p12)
}
  0x31   : > { %563 = dma.hbm_to_vmem [thread:$0]  (!%p882_p0), %s876_s7, 64, %s878_s9, %s136_s11  }
  0x32   : > { %p1034_p1 = scmp.lt.s32.totalorder %s774_s19, 3  ;;  %p1035_p2 = scmp.ge.s32.totalorder %s774_s19, 1 }
  0x33   : > { %s528_s8 = sshll.u32 %s869_s29, 3  ;;  %s545_s12 = sshll.u32 %s770_s18, 7 }
  0x34   : > { %p918_p7 = pnand %p1035_p2, %p1034_p1  ;;  %s927_s20 = scalar_lea.hbm %s1025_s2, %s545_s12 }
  0x35   : > { %s157_s22 = scalar_lea.vmem [#allocation7], %s528_s8  ;;  %s154_s7 = scalar_lea.sflag [#allocation8], %s869_s29 }
  0x36   : > { %s1036_s6 = scalar_select %p918_p7, 1, 0 }
  0x37   : > { %s167_s23 = sshll.u32 %s157_s22, 4  ;;  %s658_s9 = scalar_lea.hbm %s927_s20, 128  ;;  %s168_s23 = int_to_ptr.vmem [resolvable:$true] %s167_s23 }
  0x38   : > { %p659_p9 = scmp.ne.s32.totalorder %s927_s20, %s658_s9  ;;  %s663_s30 = scalar_lea.hbm %s1025_s2, 256 }
  0x39   : > { %p664_p3 = scmp.lt.u32.totalorder %s927_s20, %s1025_s2  ;;  %p665_p6 = scmp.lt.u32.totalorder %s663_s30, %s658_s9 }
  0x3a   : > { %p661_p11 = pnand %p659_p9, %p630_p5  ;;  %p667_p10 = scmp.lt.u32.totalorder %s658_s9, %s927_s20 }
  0x3b   : > { %p666_p4 = por %p665_p6, %p664_p3 }
  0x3c   : > { %p662_p13 = pneg %p661_p11 }
  0x3d   : > { %p668_p12 = por %p667_p10, %p666_p4 }
  0x3f   : > { %p669_p1 = pnand %p668_p12, %p662_p13 }
  0x41   : > { %672 = shalt.err (!%p669_p1)
}
  0x42   : > { %s673_s29 = scalar_lea.vmem %s168_s23, 128  ;;  %s777_s8 = smov [#allocation7]  }
  0x43   : > { %p674_p2 = scmp.ne.s32.totalorder %s168_s23, %s673_s29  ;;  %s678_s12 = sshll.u32 %s777_s8, 4  ;;  %s679_s12 = int_to_ptr.vmem [resolvable:$false] %s678_s12 }
  0x44   : > { %s680_s13 = scalar_lea.vmem %s679_s12, 256  ;;  %p681_p8 = scmp.lt.s32.totalorder %s168_s23, %s679_s12 }
  0x45   : > { %p676_p9 = pnand %p674_p2, %p630_p5  ;;  %p682_p7 = scmp.lt.s32.totalorder %s680_s13, %s673_s29 }
  0x47   : > { %p677_p11 = pneg %p676_p9  ;;  %p683_p3 = por %p682_p7, %p681_p8 }
  0x49   : > { %p684_p6 = pnand %p683_p3, %p677_p11 }
  0x4b   : > { %687 = shalt.err (!%p684_p6)
}
  0x4c   : > { %566 = dma.hbm_to_vmem [thread:$0]  (!%p882_p0), %s927_s20, 128, %s168_s23, %s154_s7  }
  0x4d   : > { %p1037_p13 = scmp.ne.s32.totalorder %s1036_s6, 0 }
  0x4e   : > { %s952_s0 = sand.u32 (!%p1037_p13), 1, %s758_s15   ;;  %p1038_p5 = scmp.ne.s32.totalorder (!%p1037_p13), %s1030_s25, 0 }
  0x4f   : > { %176 = sbr.rel (%p1037_p13) target bundleno = 854 (0x356), region = 28  ;;  %s532_s22 = sshll.u32 (!%p1037_p13), %s952_s0, 2 }
  0x50   : > { %s179_s9 = scalar_lea.sflag (!%p1037_p13), [#allocation5], %s952_s0  ;;  %s182_s11 = scalar_lea.vmem (!%p1037_p13), [#allocation4], %s532_s22 }
  0x56   : > { %741 = dma.done.wait (%p1038_p5), %s179_s9, 64  }
  0x57   : > { %743 = vsyncadd (%p1038_p5), %s179_s9, 4294967232  ;;  %s533_s10 = sshll.u32 %s952_s0, 3  ;;  %s188_s6 = scalar_lea.sflag [#allocation8], %s952_s0 }
  0x58   : > { %s191_s20 = scalar_lea.vmem [#allocation7], %s533_s10 }
  0x59   : > { %745 = dma.done.wait (%p1038_p5), %s188_s6, 128  }
  0x5a   : > { %747 = vsyncadd (%p1038_p5), %s188_s6, 4294967168  ;;  %v778_v0 = vmov 0.0   ;;  %vm779_vm0 = vmmov 0   ;;  %vm220_vm1 = vcmask 523264   ;;  %v219_v1 = vld [vmem:[%s182_s11] sm:$0xf] }
  0x5b   : > { %549 = vmatprep.subr.mxu0 %v778_v0  ;;  %551 = vmatprep.mubr.msk.f32.mxu0 %vm779_vm0, %v778_v0  ;;  %vm294_vm2 = vcmask 27648   ;;  %v309_v10 = vld [vmem:[%s191_s20] sm:$0xff]  ;;  %vm317_vm3 = vcmask 1043456   ;;  %s306_s25 = sld [smem:[#allocation3]]  ;;  %vm313_vm4 = vcmask 31744   ;;  %s546_s23 = sshll.u32 %s766_s17, 7 }
  0x5c   : > { %386 = vmatprep.mubr.f32.mxu1 %v778_v0  ;;  %550 = vmatpush3.xpose.msk.msra.mxu0 %vm220_vm1, %v219_v1  ;;  %v311_v11 = vcombine.high %v309_v10, %v309_v10  ;;  %s216_s7 = scalar_lea.vmem [#allocation9], %s533_s10  ;;  %s974_s5 = scalar_lea.hbm %s1026_s3, %s546_s23 }
  0x5d   : > { %s415_s24 = sshll.u32 %s216_s7, 4  ;;  %s399_s29 = scalar_lea.sflag [#allocation6], %s952_s0  ;;  %s976_s24 = int_to_ptr.vmem [resolvable:$true] %s415_s24 }
  0x5e   : > { %537 = vmatprep.subr.msk.mxu1 %vm317_vm3, %v311_v11  ;;  %s688_s8 = scalar_lea.vmem %s976_s24, 128  ;;  %p1039_p0 = scmp.ne.s32.totalorder %s1031_s26, 0 }
  0x5f   : > { %552 = vmatmul.mubr.msk.f32.vlgmr.msra.gmra.mrb[0].mxu0 %vm220_vm1, %v219_v1  ;;  %538 = vmatpush1.msk.msra.mxu1 %vm317_vm3, %v309_v10  ;;  %p689_p8 = scmp.ne.s32.totalorder %s976_s24, %s688_s8  ;;  %s780_s17 = smov [#allocation9]  }
  0x60   : > { %s692_s12 = sshll.u32 %s780_s17, 4  ;;  %s693_s12 = int_to_ptr.vmem [resolvable:$false] %s692_s12 }
  0x61   : > { %v307_v14 = vstv %s306_s25  ;;  %p690_p7 = pnand %p689_p8, %p1039_p0  ;;  %s694_s13 = scalar_lea.vmem %s693_s12, 256 }
  0x62   : > { %p695_p10 = scmp.lt.s32.totalorder %s976_s24, %s693_s12  ;;  %p696_p12 = scmp.lt.s32.totalorder %s694_s13, %s688_s8 }
  0x63   : > { %p691_p4 = pneg %p690_p7 }
  0x64   : > { %p697_p1 = por %p696_p12, %p695_p10 }
  0x66   : > { %p698_p2 = pnand %p697_p1, %p691_p4 }
 0x132   : > { %v290_v2 = vpop.f32.mrb[0].mxu0 }
 0x133   : > { %v553_v3 = vpop.f32.mrb[1].mxu0  ;;  %v295_v4 = vsel %vm294_vm2, %v290_v2, -inf }
 0x134   : > { %296 = vmax.xlane.f32.xlu0 %v295_v4 }
 0x1c1   : > { %v297_v5 = vpop.xlane.xlu0 %296 }
 0x1c2   : > { %v298_v6 = vsub.f32 %v290_v2, %v297_v5 }
 0x1c4   : > { %v299_v7 = vmul.f32 1.442695, %v298_v6 }
 0x1c6   : > { %624 = vpow2.f32 %v299_v7 }
 0x1d0   : > { %v625_v8 = vpop.eup %624 }
 0x1d1   : > { %v301_v9 = vsel %vm294_vm2, %v625_v8, 0.0 }
 0x1d2   : > { %302 = vadd.xlane.f32.xlu0 %v301_v9 }
 0x25f   : > { %v303_v12 = vpop.xlane.xlu0 %302 }
 0x260   : > { %626 = vrcp.f32 %v303_v12 }
 0x26a   : > { %v627_v13 = vpop.eup %626 }
 0x26b   : > { %v305_v15 = vmul.f32 %v627_v13, %v625_v8 }
 0x26d   : > { %v308_v16 = vmul.f32 %v307_v14, %v305_v15 }
 0x26f   : > { %539 = vmatmul.mubr.msk.f32.vlgmr.msra.gmra.mrb[0].mxu1 %vm313_vm4, %v308_v16 }
 0x342   : > { %v388_v17 = vpop.f32.mrb[0].mxu1 }
 0x343   : > { %v389_v18 = vadd.f32 %v388_v17, %v309_v10  ;;  %v390_v19 = vpop.f32.mrb[1].mxu1 }
 0x344   : > { %v391_v20 = vadd.f32 %v390_v19, %v311_v11 }
 0x346   : > { %v395_v21 = vcombine.low %v389_v18, %v391_v20 }
 0x348   : > { %397 = vst [vmem:[%s216_s7] sm:$0xff] %v395_v21 }
 0x349   : > { %701 = shalt.err (!%p698_p2)
}
 0x34a   : > { %s702_s0 = scalar_lea.hbm %s974_s5, 128  ;;  %s706_s11 = scalar_lea.hbm %s1026_s3, 256 }
 0x34b   : > { %p703_p9 = scmp.ne.s32.totalorder %s974_s5, %s702_s0  ;;  %p707_p6 = scmp.lt.u32.totalorder %s974_s5, %s1026_s3 }
 0x34c   : > { %p708_p13 = scmp.lt.u32.totalorder %s706_s11, %s702_s0  ;;  %p710_p8 = scmp.lt.u32.totalorder %s702_s0, %s974_s5 }
 0x34d   : > { %p704_p11 = pnand %p703_p9, %p1039_p0 }
 0x34e   : > { %p709_p5 = por %p708_p13, %p707_p6 }
 0x34f   : > { %p705_p3 = pneg %p704_p11 }
 0x350   : > { %p711_p7 = por %p710_p8, %p709_p5 }
 0x352   : > { %p712_p4 = pnand %p711_p7, %p705_p3 }
 0x354   : > { %715 = shalt.err (!%p712_p4)
}
 0x355   : > { %558 = dma.vmem_to_hbm [thread:$0]  (%p1039_p0), %s976_s24, 128, %s974_s5, %s399_s29  }
 0x356 PF: > { %s427_s20 = sand.u32 1, %s754_s14   ;;  %p1040_p10 = scmp.ne.s32.totalorder %s1032_s28, 0 }
 0x357   : > { %p1041_p12 = scmp.ge.s32.totalorder %s774_s19, 2  ;;  %s428_s25 = scalar_lea.sflag [#allocation6], %s427_s20 }
 0x359   : > { %p568_p1 = pnand %p1041_p12, %p1040_p10 }
 0x35b   : > { %749 = dma.done.wait (!%p568_p1), %s428_s25, 128  }
 0x35c   : > { %751 = vsyncadd (!%p568_p1), %s428_s25, 4294967168  ;;  %s23_s19 = sadd.s32 1, %s774_s19   ;;  %s1042_s14 = smov %s758_s15 }
 0x35d   : > { %p20_p2 = scmp.ge.s32.totalorder %s23_s19, 4   ;;  %s1043_s15 = smov %s762_s16 }
 0x35e   : > { %s1044_s16 = smov %s860_s27  ;;  %s1045_s17 = smov %s770_s18 }
 0x35f   : > { %s1046_s18 = smov %s1048_s21  ;;  %22 = sbr.rel (!%p20_p2) target bundleno = 10 (0xa), region = 86 }
 0x366   :  { %433 = vsyncpa [#allocation5], 1 }
 0x367   :  { %435 = vsyncpa [#allocation5 + $0x1], 1 }
 0x368   :  { %436 = vsyncpa [#allocation8], 1 }
 0x369   :  { %438 = vsyncpa [#allocation8 + $0x1], 1 }
 0x36a   :  { %439 = vsyncpa [#allocation6], 1 }
 0x36b   :  { %441 = vsyncpa [#allocation6 + $0x1], 1 }

</bundles_post_ra>
